<compile_context>
chip_gen: v7x
topology: tpu7x:2x2x1
jax: 0.10.0
libtpu: 0.0.40
codegen_flags: <defaults>
</compile_context>

<pallas_src>
import functools
from typing import NamedTuple

import jax
import jax.numpy as jnp
from jax.experimental import pallas as pl
from jax.experimental.pallas import tpu as pltpu


def _round_up(x, m):
    return ((x + m - 1) // m) * m


def _cdiv(a, b):
    return (a + b - 1) // b


def _pick_tile(dim_p, target):
    """Largest multiple of 128 that is <= target and divides dim_p (dim_p % 128 == 0)."""
    t = max(128, min(target, dim_p))
    t = (t // 128) * 128
    while dim_p % t != 0:
        t -= 128
    return t


def _tpu_defaults():
    """Generation-aware tile / VMEM defaults."""
    try:
        kind = jax.devices()[0].device_kind.lower()
    except Exception:
        kind = ""
    if "v5" in kind:
        # v5e: 128 MiB VMEM; HBM crossover ~240 flop/byte -> tm=256 already compute-bound.
        return dict(tm=256, tn=None, vmem_cap=100 << 20, two_tc=False)
    if "v7" in kind:
        # v7x: 64 MiB physical VMEM per TC, 2 TCs -> tile output columns, leave headroom.
        return dict(tm=512, tn=512, vmem_cap=52 << 20, two_tc=True)
    # v6e / unknown: 128 MiB VMEM; crossover ~650 flop/byte -> raise tm.
    return dict(tm=512, tn=None, vmem_cap=100 << 20, two_tc=False)


class MlpParams(NamedTuple):
    w1: jax.Array  # (in_p, hid_p)   compute dtype, padded, transposed vs torch
    b1: jax.Array  # (1, hid_p)      float32, padded
    w2: jax.Array  # (hid_p, out_p)  compute dtype, padded, transposed vs torch
    b2: jax.Array  # (1, out_p)      float32, padded
    in_features: int
    hidden_features: int
    out_features: int


def prepare_mlp_params(w1, b1, w2, b2, compute_dtype=jnp.bfloat16):
    """Pad once to 128-lane multiples and cast matmul operands to compute_dtype.

    Call this at init time, NOT per forward call (zero-padded slots contribute
    exactly 0 through both matmuls). Biases stay f32 for accurate accumulation.
    """
    in_f, hid = w1.shape
    hid2, out_f = w2.shape
    assert hid2 == hid
    in_p, hid_p, out_p = (_round_up(d, 128) for d in (in_f, hid, out_f))

    def pad2(a, rows, cols):
        if a.shape == (rows, cols):
            return a
        return jnp.zeros((rows, cols), a.dtype).at[: a.shape[0], : a.shape[1]].set(a)

    return MlpParams(
        w1=pad2(w1, in_p, hid_p).astype(compute_dtype),
        b1=pad2(b1.reshape(1, hid), 1, hid_p).astype(jnp.float32),
        w2=pad2(w2, hid_p, out_p).astype(compute_dtype),
        b2=pad2(b2.reshape(1, out_f), 1, out_p).astype(jnp.float32),
        in_features=in_f,
        hidden_features=hid,
        out_features=out_f,
    )


def _mlp_kernel(x_ref, w1_ref, b1_ref, w2_ref, b2_ref, o_ref, acc_ref, *,
                approximate_gelu):
    # x_ref:  (tm, in_p)   row tile of tokens
    # w1_ref: (in_p, tk)   fc1 weight column-tile
    # b1_ref: (1, tk)      fc1 bias tile (f32)
    # w2_ref: (tk, tn)     fc2 weight tile
    # b2_ref: (1, tn)      fc2 bias tile (f32)
    # o_ref:  (tm, tn)     output tile (same block across the k axis)
    # acc_ref:(tm, tn)     f32 accumulator scratch
    k = pl.program_id(2)

    # fc1 partial + bias + GELU, all in f32. tanh GELU runs on the EUP slot.
    h = jnp.dot(x_ref[...], w1_ref[...], preferred_element_type=jnp.float32)
    h = jax.nn.gelu(h + b1_ref[...], approximate=approximate_gelu)
    # dropout p=0.0 -> identity

    part = jnp.dot(h.astype(w2_ref.dtype), w2_ref[...],
                   preferred_element_type=jnp.float32)

    @pl.when(k == 0)
    def _():
        acc_ref[...] = part            # direct store: no zero-fill pass

    @pl.when(k > 0)
    def _():
        acc_ref[...] += part

    @pl.when(k == pl.num_programs(2) - 1)
    def _():
        o_ref[...] = (acc_ref[...] + b2_ref[...]).astype(o_ref.dtype)


def mlp_forward(x, params: MlpParams, *, tm=None, tk=512, tn=None,
                approximate_gelu=True):
    """x: (..., in_features) -> (..., out_features) using pre-padded MlpParams."""
    lead = x.shape[:-1]
    in_f = x.shape[-1]
    assert in_f == params.in_features
    out_f = params.out_features

    in_p, hid_p = params.w1.shape
    out_p = params.w2.shape[1]

    cfg = _tpu_defaults()
    compute_dtype = params.w1.dtype
    out_dtype = x.dtype
    c_item = jnp.dtype(compute_dtype).itemsize
    o_item = jnp.dtype(out_dtype).itemsize
    sublane = 8 if c_item >= 4 else 16

    x2d = x.reshape(-1, in_f)
    M = x2d.shape[0]

    # ---- row tile (big for arithmetic intensity on the weight stream) -------
    if tm is None:
        tm = cfg["tm"]
    tm = max(sublane, min(tm, _round_up(M, sublane)))
    tm = _round_up(tm, sublane)
    if cfg["two_tc"] and _cdiv(M, tm) < 2 and M > sublane:
        # v7x: make sure both TensorCores get at least one row tile.
        tm = max(sublane, _round_up(_cdiv(M, 2), sublane))
    M_p = _round_up(M, tm)

    # ---- reduction (hidden) and output-column tiles --------------------------
    tk = _pick_tile(hid_p, tk)
    tn_target = tn if tn is not None else (cfg["tn"] or out_p)
    tn = _pick_tile(out_p, tn_target)

    # ---- VMEM budget: shrink tiles until we fit the generation cap -----------
    def vmem_bytes(tm_, tk_, tn_):
        return (2 * (tm_ * in_p * c_item        # x tile (double-buffered)
                     + in_p * tk_ * c_item      # w1 tile
                     + tk_ * 4                  # b1 tile (f32)
                     + tk_ * tn_ * c_item       # w2 tile
                     + tn_ * 4                  # b2 tile (f32)
                     + tm_ * tn_ * o_item)      # out tile
                + tm_ * tn_ * 4                 # f32 accumulator scratch
                + tm_ * tk_ * 4)                # fc1/GELU f32 intermediate

    while vmem_bytes(tm, tk, tn) > cfg["vmem_cap"]:
        if tn > 256:
            tn = _pick_tile(out_p, tn // 2)
        elif tm > 2 * sublane:
            tm = _round_up(tm // 2, sublane)
            M_p = _round_up(M, tm)
        elif tk > 128:
            tk = _pick_tile(hid_p, tk // 2)
        else:
            break
    vmem_limit = int(min(cfg["vmem_cap"],
                         max(32 << 20, int(vmem_bytes(tm, tk, tn) * 1.4))))

    # ---- per-call padding of x only (weights already padded at init) --------
    if (M_p, in_p) == (M, in_f) and x2d.dtype == compute_dtype:
        x_p = x2d
    else:
        x_p = jnp.zeros((M_p, in_p), compute_dtype).at[:M, :in_f].set(
            x2d.astype(compute_dtype))

    rows_g, cols_g, red_g = M_p // tm, out_p // tn, hid_p // tk
    grid = (rows_g, cols_g, red_g)

    # Bytes reflect actual streaming: w1 refetched per (row, col) tile, w2 per row tile.
    cost = pl.CostEstimate(
        flops=2 * M_p * (in_p * hid_p + hid_p * out_p),
        transcendentals=M_p * hid_p,
        bytes_accessed=int(
            M_p * in_p * c_item
            + rows_g * cols_g * in_p * hid_p * c_item
            + rows_g * hid_p * out_p * c_item
            + (hid_p + out_p) * 4
            + M_p * out_p * o_item),
    )

    kernel = functools.partial(_mlp_kernel, approximate_gelu=approximate_gelu)

    y_p = pl.pallas_call(
        kernel,
        out_shape=jax.ShapeDtypeStruct((M_p, out_p), out_dtype),
        grid_spec=pltpu.PrefetchScalarGridSpec(
            num_scalar_prefetch=0,
            grid=grid,
            in_specs=[
                pl.BlockSpec((tm, in_p), lambda i, j, k: (i, 0)),   # x row tile
                pl.BlockSpec((in_p, tk), lambda i, j, k: (0, k)),   # fc1 W col tile
                pl.BlockSpec((1, tk), lambda i, j, k: (0, k)),      # fc1 bias tile
                pl.BlockSpec((tk, tn), lambda i, j, k: (k, j)),     # fc2 W tile
                pl.BlockSpec((1, tn), lambda i, j, k: (0, j)),      # fc2 bias tile
            ],
            out_specs=pl.BlockSpec((tm, tn), lambda i, j, k: (i, j)),
            scratch_shapes=[pltpu.VMEM((tm, tn), jnp.float32)],
        ),
        compiler_params=pltpu.CompilerParams(
            dimension_semantics=("parallel", "parallel", "arbitrary"),
            vmem_limit_bytes=vmem_limit,
        ),
        cost_estimate=cost,
    )(x_p, params.w1, params.b1, params.w2, params.b2)

    return y_p[:M, :out_f].reshape(*lead, out_f)


def init_mlp_params(key, in_features, hidden_features, out_features, dtype=jnp.float32):
    """Deterministic init mimicking nn.Linear's uniform(-1/sqrt(fan_in), 1/sqrt(fan_in))."""
    k1, k2, k3, k4 = jax.random.split(key, 4)
    lim1 = 1.0 / (in_features ** 0.5)
    lim2 = 1.0 / (hidden_features ** 0.5)
    # stored transposed vs torch: (in, hidden) and (hidden, out)
    w1 = jax.random.uniform(k1, (in_features, hidden_features), dtype, -lim1, lim1)
    b1 = jax.random.uniform(k2, (1, hidden_features), dtype, -lim1, lim1)
    w2 = jax.random.uniform(k3, (hidden_features, out_features), dtype, -lim2, lim2)
    b2 = jax.random.uniform(k4, (1, out_features), dtype, -lim2, lim2)
    return w1, b1, w2, b2


if __name__ == "__main__":
    # Small shapes consistent with a transformer MLP block:
    # batch=2, seq=8, in_features=32, hidden_features=64, out_features=32
    B, S, in_f, hid, out_f = 2, 8, 32, 64, 32

    key = jax.random.PRNGKey(0)
    kx, kp = jax.random.split(key)
    x = jax.random.normal(kx, (B, S, in_f), jnp.float32)
    w1, b1, w2, b2 = init_mlp_params(kp, in_f, hid, out_f)

    # 1) Performance configuration: bf16 MXU operands + tanh GELU (defaults).
    params_fast = prepare_mlp_params(w1, b1, w2, b2, compute_dtype=jnp.bfloat16)
    y_fast = mlp_forward(x, params_fast, approximate_gelu=True)
    jax.block_until_ready(y_fast)

    # 2) Exact configuration: f32 operands + erf GELU (bitwise-closest to nn.GELU()).
    params_exact = prepare_mlp_params(w1, b1, w2, b2, compute_dtype=jnp.float32)
    y_exact = mlp_forward(x, params_exact, approximate_gelu=False)
    jax.block_until_ready(y_exact)

    # Pure-JAX references of the same math.
    x2d = x.reshape(B * S, in_f)
    h_ref = jnp.dot(x2d, w1) + b1
    ref_exact = (jnp.dot(jax.nn.gelu(h_ref, approximate=False), w2) + b2).reshape(B, S, out_f)
    ref_approx = (jnp.dot(jax.nn.gelu(h_ref, approximate=True), w2) + b2).reshape(B, S, out_f)

    assert y_exact.shape == (B, S, out_f) and y_fast.shape == (B, S, out_f)
    assert jnp.allclose(y_exact, ref_exact, atol=1e-5, rtol=1e-5)
    # bf16 operand cast -> documented looser tolerance vs. f32 reference.
    assert jnp.allclose(y_fast, ref_approx, atol=5e-2, rtol=5e-2)

    print("KERNEL_OK")
</pallas_src>

<mosaic_0001>
module attributes {stable_mosaic.version = 11 : i64} {
  func.func @_mlp_kernel(%arg0: i32, %arg1: i32, %arg2: i32, %arg3: memref<16x128xbf16, #tpu.memory_space<vmem>>, %arg4: memref<128x128xbf16, #tpu.memory_space<vmem>>, %arg5: memref<1x128xf32, #tpu.memory_space<vmem>>, %arg6: memref<128x128xbf16, #tpu.memory_space<vmem>>, %arg7: memref<1x128xf32, #tpu.memory_space<vmem>>, %arg8: memref<16x128xf32, #tpu.memory_space<vmem>>, %arg9: memref<16x128xf32, #tpu.memory_space<vmem>>) attributes {dimension_semantics = [#tpu.dimension_semantics<parallel>, #tpu.dimension_semantics<parallel>, #tpu.dimension_semantics<arbitrary>], iteration_bounds = array<i64: 1, 1, 1>, scalar_prefetch = 0 : i64, scratch_operands = 1 : i64, tpu.core_type = #tpu.core_type<tc>, window_params = [{transform_indices = @transform_0, window_bounds = array<i64: 16, 128>}, {transform_indices = @transform_1, window_bounds = array<i64: 128, 128>}, {transform_indices = @transform_2, window_bounds = array<i64: 1, 128>}, {transform_indices = @transform_3, window_bounds = array<i64: 128, 128>}, {transform_indices = @transform_4, window_bounds = array<i64: 1, 128>}, {transform_indices = @transform_5, window_bounds = array<i64: 16, 128>}]} {
    %c0 = arith.constant 0 : index
    %c0_0 = arith.constant 0 : index
    %0 = vector.load %arg3[%c0, %c0_0] : memref<16x128xbf16, #tpu.memory_space<vmem>>, vector<16x128xbf16>
    %c0_1 = arith.constant 0 : index
    %c0_2 = arith.constant 0 : index
    %1 = vector.load %arg4[%c0_1, %c0_2] : memref<128x128xbf16, #tpu.memory_space<vmem>>, vector<128x128xbf16>
    %cst = arith.constant dense<0.000000e+00> : vector<16x128xf32>
    %2 = tpu.matmul %0, %1, %cst {dimension_numbers = #tpu.dot_dimension_numbers<[1], [0], [0], [1], [0, 0, 1, 1], [], []>} : vector<16x128xbf16>, vector<128x128xbf16>, vector<16x128xf32> -> vector<16x128xf32>
    %c0_3 = arith.constant 0 : index
    %c0_4 = arith.constant 0 : index
    %3 = vector.load %arg5[%c0_3, %c0_4] : memref<1x128xf32, #tpu.memory_space<vmem>>, vector<1x128xf32>
    %4 = vector.broadcast %3 : vector<1x128xf32> to vector<16x128xf32>
    %5 = arith.addf %2, %4 : vector<16x128xf32>
    %6 = arith.mulf %5, %5 : vector<16x128xf32>
    %7 = arith.mulf %5, %6 : vector<16x128xf32>
    %cst_5 = arith.constant 4.471500e-02 : f32
    %8 = vector.broadcast %cst_5 : f32 to vector<16x128xf32>
    %9 = arith.mulf %8, %7 : vector<16x128xf32>
    %10 = arith.addf %5, %9 : vector<16x128xf32>
    %cst_6 = arith.constant 0.797884583 : f32
    %11 = vector.broadcast %cst_6 : f32 to vector<16x128xf32>
    %12 = arith.mulf %11, %10 : vector<16x128xf32>
    %13 = math.tanh %12 : vector<16x128xf32>
    %cst_7 = arith.constant 1.000000e+00 : f32
    %14 = vector.broadcast %cst_7 : f32 to vector<16x128xf32>
    %15 = arith.addf %14, %13 : vector<16x128xf32>
    %cst_8 = arith.constant 5.000000e-01 : f32
    %16 = vector.broadcast %cst_8 : f32 to vector<16x128xf32>
    %17 = arith.mulf %16, %15 : vector<16x128xf32>
    %18 = arith.mulf %5, %17 : vector<16x128xf32>
    %19 = arith.truncf %18 : vector<16x128xf32> to vector<16x128xbf16>
    %c0_9 = arith.constant 0 : index
    %c0_10 = arith.constant 0 : index
    %20 = vector.load %arg6[%c0_9, %c0_10] : memref<128x128xbf16, #tpu.memory_space<vmem>>, vector<128x128xbf16>
    %cst_11 = arith.constant dense<0.000000e+00> : vector<16x128xf32>
    %21 = tpu.matmul %19, %20, %cst_11 {dimension_numbers = #tpu.dot_dimension_numbers<[1], [0], [0], [1], [0, 0, 1, 1], [], []>} : vector<16x128xbf16>, vector<128x128xbf16>, vector<16x128xf32> -> vector<16x128xf32>
    %c0_i32 = arith.constant 0 : i32
    %22 = arith.cmpi eq, %arg2, %c0_i32 : i32
    %23 = arith.extui %22 : i1 to i32
    %c0_i32_12 = arith.constant 0 : i32
    %24 = arith.cmpi ne, %23, %c0_i32_12 : i32
    scf.if %24 {
      %c0_17 = arith.constant 0 : index
      %c0_18 = arith.constant 0 : index
      %31 = vector.load %arg9[%c0_17, %c0_18] : memref<16x128xf32, #tpu.memory_space<vmem>>, vector<16x128xf32>
      tpu.vector_store %arg9[%c0_17, %c0_18], %21 {strides = array<i32>} : memref<16x128xf32, #tpu.memory_space<vmem>>, vector<16x128xf32>,
    } else {
    }
    %c0_i32_13 = arith.constant 0 : i32
    %25 = arith.cmpi sgt, %arg2, %c0_i32_13 : i32
    %26 = arith.extui %25 : i1 to i32
    %c0_i32_14 = arith.constant 0 : i32
    %27 = arith.cmpi ne, %26, %c0_i32_14 : i32
    scf.if %27 {
      %c0_17 = arith.constant 0 : index
      %c0_18 = arith.constant 0 : index
      %31 = vector.load %arg9[%c0_17, %c0_18] : memref<16x128xf32, #tpu.memory_space<vmem>>, vector<16x128xf32>
      %32 = arith.addf %31, %21 : vector<16x128xf32>
      %c0_19 = arith.constant 0 : index
      %c0_20 = arith.constant 0 : index
      %33 = vector.load %arg9[%c0_19, %c0_20] : memref<16x128xf32, #tpu.memory_space<vmem>>, vector<16x128xf32>
      tpu.vector_store %arg9[%c0_19, %c0_20], %32 {strides = array<i32>} : memref<16x128xf32, #tpu.memory_space<vmem>>, vector<16x128xf32>,
    } else {
    }
    %c0_i32_15 = arith.constant 0 : i32
    %28 = arith.cmpi eq, %arg2, %c0_i32_15 : i32
    %29 = arith.extui %28 : i1 to i32
    %c0_i32_16 = arith.constant 0 : i32
    %30 = arith.cmpi ne, %29, %c0_i32_16 : i32
    scf.if %30 {
      %c0_17 = arith.constant 0 : index
      %c0_18 = arith.constant 0 : index
      %31 = vector.load %arg9[%c0_17, %c0_18] : memref<16x128xf32, #tpu.memory_space<vmem>>, vector<16x128xf32>
      %c0_19 = arith.constant 0 : index
      %c0_20 = arith.constant 0 : index
      %32 = vector.load %arg7[%c0_19, %c0_20] : memref<1x128xf32, #tpu.memory_space<vmem>>, vector<1x128xf32>
      %33 = vector.broadcast %32 : vector<1x128xf32> to vector<16x128xf32>
      %34 = arith.addf %31, %33 : vector<16x128xf32>
      %c0_21 = arith.constant 0 : index
      %c0_22 = arith.constant 0 : index
      %35 = vector.load %arg8[%c0_21, %c0_22] : memref<16x128xf32, #tpu.memory_space<vmem>>, vector<16x128xf32>
      tpu.vector_store %arg8[%c0_21, %c0_22], %34 {strides = array<i32>} : memref<16x128xf32, #tpu.memory_space<vmem>>, vector<16x128xf32>,
    } else {
    }
    return
  }
  func.func @transform_0(%arg0: i32, %arg1: i32, %arg2: i32) -> (i32, i32) {
    %c0_i32 = arith.constant 0 : i32
    %c0_i32_0 = arith.constant 0 : i32
    return %arg0, %c0_i32 : i32, i32
  }
  func.func @transform_1(%arg0: i32, %arg1: i32, %arg2: i32) -> (i32, i32) {
    %c0_i32 = arith.constant 0 : i32
    %c0_i32_0 = arith.constant 0 : i32
    return %c0_i32, %arg2 : i32, i32
  }
  func.func @transform_2(%arg0: i32, %arg1: i32, %arg2: i32) -> (i32, i32) {
    %c0_i32 = arith.constant 0 : i32
    %c0_i32_0 = arith.constant 0 : i32
    return %c0_i32, %arg2 : i32, i32
  }
  func.func @transform_3(%arg0: i32, %arg1: i32, %arg2: i32) -> (i32, i32) {
    %c0_i32 = arith.constant 0 : i32
    return %arg2, %arg1 : i32, i32
  }
  func.func @transform_4(%arg0: i32, %arg1: i32, %arg2: i32) -> (i32, i32) {
    %c0_i32 = arith.constant 0 : i32
    %c0_i32_0 = arith.constant 0 : i32
    return %c0_i32, %arg1 : i32, i32
  }
  func.func @transform_5(%arg0: i32, %arg1: i32, %arg2: i32) -> (i32, i32) {
    %c0_i32 = arith.constant 0 : i32
    return %arg0, %arg1 : i32, i32
  }
}

</mosaic_0001>

<bundles_post_ra>
// kernel: tpu_custom_call.1
= control target key start
LH: loop header
LB: loop body
LE: loop exit
PB: predicated region body
PF: predicated region fallthrough
CT: control target
= control target key end

     0   :  { %10 = vsyncpa [#allocation4], 0  ;;  %s669_s0 = inlined_call_operand.hbm [shape: bf16[16,128], index: 0, kind: input, shape index: {}]   ;;  %s670_s1 = inlined_call_operand.hbm [shape: bf16[128,128], index: 1, kind: input, shape index: {}]   ;;  %s671_s2 = inlined_call_operand.vmem [shape: f32[1,128], index: 2, kind: input, shape index: {}]   ;;  %s672_s3 = inlined_call_operand.hbm [shape: bf16[128,128], index: 3, kind: input, shape index: {}]   ;;  %s673_s4 = inlined_call_operand.vmem [shape: f32[1,128], index: 4, kind: input, shape index: {}]   ;;  %s674_s5 = inlined_call_operand.hbm [shape: f32[16,128], index: 5, kind: output, shape index: {}]  }
   0x1   :  { %11 = vsyncpa [#allocation7], 0 }
   0x2   :  { %12 = vsyncpa [#allocation5], 0  ;;  %s559_s18 = smov [#allocation6]   ;;  %s560_s20 = smov [#allocation3]  }
   0x3   :  { %s30_s19 = sshll.u32 %s559_s18, 4  ;;  %s18_s21 = sshll.u32 %s560_s20, 4  ;;  %s31_s19 = int_to_ptr.vmem [resolvable:$true] %s30_s19  ;;  %s599_s21 = int_to_ptr.vmem [resolvable:$true] %s18_s21 }
   0x4   :  { %s465_s24 = scalar_lea.hbm %s670_s1, 1024 }
   0x5   :  { %p466_p0 = scmp.ne.s32.totalorder %s670_s1, %s465_s24  ;;  %p469_p1 = scmp.lt.u32.totalorder %s465_s24, %s670_s1 }
   0x7   :  { %p471_p2 = pnand %p469_p1, %p466_p0 }
   0x9   :  { %474 = shalt.err (!%p471_p2)
}
   0xa   :  { %s475_s29 = scalar_lea.vmem %s31_s19, 1024  ;;  %p480_p4 = scmp.lt.s32.totalorder %s31_s19, %s31_s19 }
   0xb   :  { %p476_p3 = scmp.ne.s32.totalorder %s31_s19, %s475_s29  ;;  %p481_p5 = scmp.lt.s32.totalorder %s475_s29, %s475_s29 }
   0xd   :  { %p482_p6 = por %p481_p5, %p480_p4 }
   0xf   :  { %p483_p7 = pnand %p482_p6, %p476_p3 }
  0x11   :  { %486 = shalt.err (!%p483_p7)
}
  0x12   :  { %s561_s30 = smov 64   ;;  %s562_s6 = smov 4  }
  0x13   :  { %36 = dma.hbm_to_vmem [thread:$0]  %s670_s1, 1024, %s31_s19, [#allocation7], %s561_s30, %s561_s30, %s562_s6  }
  0x14   :  { %s487_s11 = scalar_lea.hbm %s669_s0, 128 }
  0x15   :  { %p488_p8 = scmp.ne.s32.totalorder %s669_s0, %s487_s11  ;;  %p491_p9 = scmp.lt.u32.totalorder %s487_s11, %s669_s0 }
  0x17   :  { %p493_p10 = pnand %p491_p9, %p488_p8 }
  0x19   :  { %496 = shalt.err (!%p493_p10)
}
  0x1a   :  { %s497_s16 = scalar_lea.vmem %s599_s21, 128  ;;  %p502_p12 = scmp.lt.s32.totalorder %s599_s21, %s599_s21 }
  0x1b   :  { %p498_p11 = scmp.ne.s32.totalorder %s599_s21, %s497_s16  ;;  %p503_p13 = scmp.lt.s32.totalorder %s497_s16, %s497_s16 }
  0x1d   :  { %p504_p0 = por %p503_p13, %p502_p12 }
  0x1f   :  { %p505_p1 = pnand %p504_p0, %p498_p11 }
  0x21   :  { %508 = shalt.err (!%p505_p1)
}
  0x22   :  { %24 = dma.hbm_to_vmem [thread:$0]  %s669_s0, 128, %s599_s21, [#allocation4], %s561_s30, %s561_s30, %s562_s6  }
  0x23   :  { %s563_s18 = smov [#allocation8]   ;;  %s509_s23 = scalar_lea.hbm %s672_s3, 1024 }
  0x24   :  { %s44_s19 = sshll.u32 %s563_s18, 4  ;;  %p510_p2 = scmp.ne.s32.totalorder %s672_s3, %s509_s23  ;;  %s45_s19 = int_to_ptr.vmem [resolvable:$true] %s44_s19 }
  0x25   :  { %p513_p3 = scmp.lt.u32.totalorder %s509_s23, %s672_s3 }
  0x27   :  { %p515_p4 = pnand %p513_p3, %p510_p2 }
  0x29   :  { %518 = shalt.err (!%p515_p4)
}
  0x2a   :  { %s519_s28 = scalar_lea.vmem %s45_s19, 1024  ;;  %p524_p6 = scmp.lt.s32.totalorder %s45_s19, %s45_s19 }
  0x2b   :  { %p520_p5 = scmp.ne.s32.totalorder %s45_s19, %s519_s28  ;;  %p525_p7 = scmp.lt.s32.totalorder %s519_s28, %s519_s28 }
  0x2d   :  { %p526_p8 = por %p525_p7, %p524_p6 }
  0x2f   :  { %p527_p9 = pnand %p526_p8, %p520_p5 }
  0x31   :  { %530 = shalt.err (!%p527_p9)
}
  0x32   :  { %50 = dma.hbm_to_vmem [thread:$0]  %s672_s3, 1024, %s45_s19, [#allocation7], %s561_s30, %s561_s30, %s562_s6  }
  0x33   :  { %553 = dma.done.wait [#allocation4], 128  }
  0x34   :  { %554 = vsyncadd [#allocation4], 4294967168 }
  0x35   :  { %555 = dma.done.wait [#allocation7], 2048  }
  0x36   :  { %556 = vsyncadd [#allocation7], 4294965248  ;;  %v564_v0 = vmov 0.0   ;;  %vm565_vm0 = vmmov 0   ;;  %v444_v1 = vld [vmem:[#allocation6] sm:$0xff]   ;;  %v445_v2 = vld [vmem:[#allocation6 + $0x8] sm:$0xff]  }
  0x37   :  { %394 = vmatprep.subr.bf16.mxu0 %v564_v0  ;;  %410 = vmatprep.mubr.msk.bf16.mxu0 %vm565_vm0, %v564_v0  ;;  %v446_v3 = vld [vmem:[#allocation6 + $0x10] sm:$0xff]   ;;  %v447_v4 = vld [vmem:[#allocation6 + $0x18] sm:$0xff]   ;;  %v448_v5 = vld [vmem:[#allocation6 + $0x20] sm:$0xff]   ;;  %s566_s6 = smov [#allocation9]  }
  0x38   :  { %414 = vmatprep.subr.bf16.mxu1 %v564_v0  ;;  %430 = vmatprep.mubr.msk.bf16.mxu1 %vm565_vm0, %v564_v0  ;;  %v449_v6 = vld [vmem:[#allocation6 + $0x28] sm:$0xff]   ;;  %v450_v7 = vld [vmem:[#allocation6 + $0x30] sm:$0xff]   ;;  %v451_v8 = vld [vmem:[#allocation6 + $0x38] sm:$0xff]   ;;  %s344_s7 = sshll.u32 %s566_s6, 4  ;;  %s345_s7 = int_to_ptr.vmem [resolvable:$true] %s344_s7 }
  0x39   :  { %395 = vmatpush3.bf16.msra.mxu0 %v444_v1  ;;  %v452_v9 = vld [vmem:[#allocation3] sm:$0xff]   ;;  %v453_v10 = vld [vmem:[#allocation8] sm:$0xff]   ;;  %v454_v11 = vld [vmem:[#allocation8 + $0x8] sm:$0xff]   ;;  %s531_s8 = scalar_lea.vmem %s345_s7, 256  ;;  %p536_p11 = scmp.lt.s32.totalorder %s345_s7, %s345_s7 }
  0x3a   :  { %396 = vmatprep.subr.bf16.mxu0 %v564_v0  ;;  %415 = vmatpush3.bf16.msra.mxu1 %v453_v10  ;;  %v455_v12 = vld [vmem:[#allocation8 + $0x10] sm:$0xff]   ;;  %v456_v13 = vld [vmem:[#allocation8 + $0x18] sm:$0xff]   ;;  %v457_v14 = vld [vmem:[#allocation8 + $0x20] sm:$0xff]   ;;  %p532_p10 = scmp.ne.s32.totalorder %s345_s7, %s531_s8  ;;  %p537_p12 = scmp.lt.s32.totalorder %s531_s8, %s531_s8 }
  0x3b   :  { %416 = vmatprep.subr.bf16.mxu1 %v564_v0  ;;  %v458_v15 = vld [vmem:[#allocation8 + $0x28] sm:$0xff]   ;;  %v459_v16 = vld [vmem:[#allocation8 + $0x30] sm:$0xff]   ;;  %v460_v17 = vld [vmem:[#allocation8 + $0x38] sm:$0xff]  }
  0x3c   :  { %v357_v18 = vld [vmem:[%s671_s2] ss:$0 sm:$0xff]  ;;  %p538_p13 = por %p537_p12, %p536_p11 }
  0x3d   :  { %397 = vmatpush3.bf16.msra.mxu0 %v445_v2  ;;  %v375_v44 = vld [vmem:[%s673_s4] ss:$0 sm:$0xff] }
  0x3e   :  { %398 = vmatprep.subr.bf16.mxu0 %v564_v0  ;;  %417 = vmatpush3.bf16.msra.mxu1 %v454_v11  ;;  %p539_p0 = pnand %p538_p13, %p532_p10 }
  0x3f   :  { %418 = vmatprep.subr.bf16.mxu1 %v564_v0 }
  0x41   :  { %399 = vmatpush3.bf16.msra.mxu0 %v446_v3 }
  0x42   :  { %400 = vmatprep.subr.bf16.mxu0 %v564_v0  ;;  %419 = vmatpush3.bf16.msra.mxu1 %v455_v12 }
  0x43   :  { %420 = vmatprep.subr.bf16.mxu1 %v564_v0 }
  0x45   :  { %401 = vmatpush3.bf16.msra.mxu0 %v447_v4 }
  0x46   :  { %402 = vmatprep.subr.bf16.mxu0 %v564_v0  ;;  %421 = vmatpush3.bf16.msra.mxu1 %v456_v13 }
  0x47   :  { %422 = vmatprep.subr.bf16.mxu1 %v564_v0 }
  0x49   :  { %403 = vmatpush3.bf16.msra.mxu0 %v448_v5 }
  0x4a   :  { %404 = vmatprep.subr.bf16.mxu0 %v564_v0  ;;  %423 = vmatpush3.bf16.msra.mxu1 %v457_v14 }
  0x4b   :  { %424 = vmatprep.subr.bf16.mxu1 %v564_v0 }
  0x4d   :  { %405 = vmatpush3.bf16.msra.mxu0 %v449_v6 }
  0x4e   :  { %406 = vmatprep.subr.bf16.mxu0 %v564_v0  ;;  %425 = vmatpush3.bf16.msra.mxu1 %v458_v15 }
  0x4f   :  { %426 = vmatprep.subr.bf16.mxu1 %v564_v0 }
  0x51   :  { %407 = vmatpush3.bf16.msra.mxu0 %v450_v7 }
  0x52   :  { %408 = vmatprep.subr.bf16.mxu0 %v564_v0  ;;  %427 = vmatpush3.bf16.msra.mxu1 %v459_v16 }
  0x53   :  { %428 = vmatprep.subr.bf16.mxu1 %v564_v0 }
  0x55   :  { %409 = vmatpush3.bf16.msra.mxu0 %v451_v8 }
  0x56   :  { %429 = vmatpush3.bf16.msra.mxu1 %v460_v17 }
  0x58   :  { %411 = vmatmul.mubr.bf16.vlgmr.msra.gmra.mrb[0].mxu0 %v452_v9 }
 0x12b   :  { %v176_v19 = vpop.f32.mrb[0].mxu0 }
 0x12c   :  { %v177_v20 = vadd.f32 %v357_v18, %v176_v19  ;;  %v412_v21 = vpop.f32.mrb[1].mxu0 }
 0x12d   :  { %v179_v22 = vpop.f32.mrb[2].mxu0 }
 0x12e   :  { %v183_v23 = vmul.f32 %v177_v20, %v177_v20  ;;  %v180_v24 = vadd.f32 %v357_v18, %v179_v22  ;;  %v413_v25 = vpop.f32.mrb[3].mxu0 }
 0x130   :  { %v185_v26 = vmul.f32 %v183_v23, %v177_v20  ;;  %v184_v27 = vmul.f32 %v180_v24, %v180_v24 }
 0x132   :  { %v187_v28 = vmul.f32 0.044715, %v185_v26  ;;  %v186_v29 = vmul.f32 %v184_v27, %v180_v24 }
 0x134   :  { %v189_v30 = vadd.f32 %v187_v28, %v177_v20  ;;  %v188_v31 = vmul.f32 0.044715, %v186_v29 }
 0x136   :  { %v191_v32 = vmul.f32 0.7978846, %v189_v30  ;;  %v190_v33 = vadd.f32 %v188_v31, %v180_v24 }
 0x138   :  { %461 = vtanh.f32 %v191_v32  ;;  %v192_v34 = vmul.f32 0.7978846, %v190_v33 }
 0x13a   :  { %463 = vtanh.f32 %v192_v34 }
 0x142   :  { %v462_v35 = vpop.eup %461 }
 0x143   :  { %v195_v36 = vadd.f32 1.0, %v462_v35 }
 0x144   :  { %v464_v37 = vpop.eup %463 }
 0x145   :  { %v196_v38 = vadd.f32 1.0, %v464_v37  ;;  %v197_v39 = vmul.f32 0.5, %v195_v36 }
 0x147   :  { %v198_v40 = vmul.f32 0.5, %v196_v38  ;;  %v199_v41 = vmul.f32 %v197_v39, %v177_v20 }
 0x149   :  { %v200_v42 = vmul.f32 %v198_v40, %v180_v24 }
 0x14b   :  { %v201_v43 = vpack.c.bf16 %v200_v42, %v199_v41 }
 0x14d   :  { %431 = vmatmul.mubr.bf16.vlgmr.msra.gmra.mrb[0].mxu1 %v201_v43 }
 0x220   :  { %v300_v45 = vpop.f32.mrb[0].mxu1 }
 0x221   :  { %v335_v46 = vadd.f32 %v375_v44, %v300_v45  ;;  %v432_v47 = vpop.f32.mrb[1].mxu1 }
 0x222   :  { %v303_v48 = vpop.f32.mrb[2].mxu1 }
 0x223   :  { %337 = vst [vmem:[#allocation9] sm:$0xff] %v335_v46  ;;  %v336_v49 = vadd.f32 %v375_v44, %v303_v48  ;;  %v433_v50 = vpop.f32.mrb[3].mxu1 }
 0x225   :  { %338 = vst [vmem:[#allocation9 + $0x8] sm:$0xff] %v336_v49 }
 0x226   :  { %542 = shalt.err (!%p539_p0)
}
 0x227   :  { %s543_s10 = scalar_lea.hbm %s674_s5, 256 }
 0x228   :  { %p544_p1 = scmp.ne.s32.totalorder %s674_s5, %s543_s10  ;;  %p547_p2 = scmp.lt.u32.totalorder %s543_s10, %s674_s5 }
 0x22a   :  { %p549_p3 = pnand %p547_p2, %p544_p1 }
 0x22c   :  { %552 = shalt.err (!%p549_p3)
}
 0x22d   :  { %s567_s15 = smov 128   ;;  %s568_s16 = smov 8  }
 0x22e   :  { %350 = dma.vmem_to_hbm [thread:$0]  %s345_s7, 256, %s674_s5, [#allocation5], %s567_s15, %s567_s15, %s568_s16  }
 0x22f   :  { %557 = dma.done.wait [#allocation5], 256  }
 0x230   :  { %558 = vsyncadd [#allocation5], 4294967040 }
 0x231   :  { %354 = vsyncpa [#allocation4], 1 }
 0x232   :  { %355 = vsyncpa [#allocation7], 1 }
 0x233   :  { %356 = vsyncpa [#allocation5], 1 }

</bundles_post_ra>
